<compile_context>
chip_gen: v7x
topology: tpu7x:2x2x1
jax: 0.10.0
libtpu: 0.0.40
codegen_flags: <defaults>
</compile_context>

<pallas_src>
import functools

import jax
import jax.numpy as jnp
from jax.experimental import pallas as pl
from jax.experimental.pallas import tpu as pltpu

LEAKY_SLOPE = 0.2
BN_EPS = 1e-5
LANE = 128
SUBLANE = 8


def _round_up(n, m):
    return ((n + m - 1) // m) * m


def _leaky(v):
    return jnp.where(v >= 0, v, LEAKY_SLOPE * v)


def _vmem_limit_bytes(block_bytes):
    """Shape-derived scoped-VMEM limit: double-buffered blocks + headroom."""
    need = 2 * sum(block_bytes) + (2 << 20)
    # floor well above the tiny demo usage, cap at v7x physical VMEM budget
    return int(min(max(need, 16 << 20), 64 << 20))


# --------------------------------------------------------------------------
# Pass 1: conv-as-matmul + batch statistics (accumulated across batch tiles)
# --------------------------------------------------------------------------
def _conv_stats_kernel(x_ref, wc_ref, gb_ref, y_ref, ab_ref, *, inv_batch):
    """x:[TB,K] f32, wc:[K,Cp] bf16, gb:[8,Cp] f32 (gamma,beta rows)
       y:[TB,Cp] f32 (tiled out), ab:[8,Cp] f32 (resident accumulator out)."""
    t = pl.program_id(0)

    # bf16 cast happens HERE (x arrives straight from HBM as f32).
    y = jnp.dot(x_ref[...].astype(jnp.bfloat16), wc_ref[...],
                preferred_element_type=jnp.float32)          # [TB, Cp] f32
    y_ref[...] = y

    @pl.when(t == 0)
    def _():
        ab_ref[...] = jnp.zeros_like(ab_ref)

    # Running per-channel sum / sum-of-squares (zero-padded batch rows add 0).
    ab_ref[0:1, :] += jnp.sum(y, axis=0, keepdims=True)
    ab_ref[1:2, :] += jnp.sum(y * y, axis=0, keepdims=True)

    @pl.when(t == pl.num_programs(0) - 1)
    def _():
        mean = ab_ref[0:1, :] * inv_batch                    # divide by REAL B
        var = jnp.maximum(ab_ref[1:2, :] * inv_batch - mean * mean, 0.0)
        a = gb_ref[0:1, :] * jax.lax.rsqrt(var + BN_EPS)     # gamma / sqrt(var+eps)
        ab_ref[1:2, :] = gb_ref[1:2, :] - mean * a           # beta - mean * a
        ab_ref[0:1, :] = a


# --------------------------------------------------------------------------
# Pass 2: BN affine + LeakyReLU + Linear + LeakyReLU + Linear (per batch tile)
# --------------------------------------------------------------------------
def _bn_mlp_kernel(y_ref, ab_ref, w1_ref, w2_ref, bias_ref, out_ref):
    h_pad = w1_ref.shape[1]
    n_pad = w2_ref.shape[1]

    yn = _leaky(y_ref[...] * ab_ref[0:1, :] + ab_ref[1:2, :])        # f32 VPU
    h = _leaky(jnp.dot(yn.astype(jnp.bfloat16), w1_ref[...],
                       preferred_element_type=jnp.float32)
               + bias_ref[0:1, :h_pad])
    out_ref[...] = (jnp.dot(h.astype(jnp.bfloat16), w2_ref[...],
                            preferred_element_type=jnp.float32)
                    + bias_ref[1:2, :n_pad])


# --------------------------------------------------------------------------
# Parameters
# --------------------------------------------------------------------------
def init_params(key, latent_channels, hidden, n_attr):
    # nn.Conv2d(latent, 512) + nn.Linear(latent, hidden) is only shape
    # consistent when conv-out-channels == latent_channels and the conv output
    # is 1x1 (the module's default 512/512 case); we keep that constraint.
    c_out = latent_channels
    ks = jax.random.split(key, 6)
    return {
        "conv_w": 0.05 * jax.random.normal(ks[0], (c_out, latent_channels, 4, 4), jnp.float32),
        "conv_b": 0.05 * jax.random.normal(ks[1], (c_out,), jnp.float32),  # cancelled by BN
        "bn_gamma": jnp.ones((c_out,), jnp.float32),   # PyTorch BatchNorm2d defaults
        "bn_beta": jnp.zeros((c_out,), jnp.float32),
        "w1": 0.05 * jax.random.normal(ks[2], (hidden, latent_channels), jnp.float32),
        "b1": 0.05 * jax.random.normal(ks[3], (hidden,), jnp.float32),
        "w2": 0.05 * jax.random.normal(ks[4], (2 * n_attr, hidden), jnp.float32),
        "b2": 0.05 * jax.random.normal(ks[5], (2 * n_attr,), jnp.float32),
    }


def prepare_params(params):
    """One-time weight preprocessing (tap slice, transpose, lane-pad, bf16 cast)."""
    conv_w = params["conv_w"]
    c_out, c_in = conv_w.shape[0], conv_w.shape[1]
    hidden = params["w1"].shape[0]
    n_out = params["w2"].shape[0]

    k = c_in * 4
    c_pad = _round_up(c_out, LANE)
    h_pad = _round_up(hidden, LANE)
    n_pad = _round_up(n_out, LANE)
    max_w = max(h_pad, n_pad)

    # Central 2x2 taps of each 4x4 kernel, flattened to match x.reshape(B, C*2*2).
    wc = jnp.zeros((k, c_pad), jnp.float32)
    wc = wc.at[:, :c_out].set(conv_w[:, :, 1:3, 1:3].reshape(c_out, k).T)

    w1t = jnp.zeros((c_pad, h_pad), jnp.float32)
    w1t = w1t.at[:c_out, :hidden].set(params["w1"].T)
    w2t = jnp.zeros((h_pad, n_pad), jnp.float32)
    w2t = w2t.at[:hidden, :n_out].set(params["w2"].T)

    gb = jnp.zeros((8, c_pad), jnp.float32)
    gb = gb.at[0, :c_out].set(params["bn_gamma"]).at[1, :c_out].set(params["bn_beta"])

    bias = jnp.zeros((8, max_w), jnp.float32)
    bias = bias.at[0, :hidden].set(params["b1"]).at[1, :n_out].set(params["b2"])

    return {
        "wc": jax.device_put(wc.astype(jnp.bfloat16)),
        "w1t": jax.device_put(w1t.astype(jnp.bfloat16)),
        "w2t": jax.device_put(w2t.astype(jnp.bfloat16)),
        "gb": jax.device_put(gb),
        "bias": jax.device_put(bias),
        "c_pad": c_pad, "h_pad": h_pad, "n_pad": n_pad,
        "max_w": max_w, "n_out": n_out,
    }


# --------------------------------------------------------------------------
# Forward
# --------------------------------------------------------------------------
def discriminator_forward(x_nchw, prep, tb=None, unpad=True):
    """x_nchw: [B, C_in, 2, 2] float32 (NCHW, like the PyTorch module)."""
    B, c_in, H, W = x_nchw.shape
    assert (H, W) == (2, 2), "Conv(k=4,s=2,p=1) must yield a 1x1 map for Flatten->Linear"
    K = c_in * 4
    c_pad, h_pad, n_pad, max_w = prep["c_pad"], prep["h_pad"], prep["n_pad"], prep["max_w"]

    if tb is None:
        # At real shapes prefer >=256 (full MXU M on v6e/v7x); keep tiles
        # sublane-aligned.  v5e saturates at 128 already.
        tb = min(256, _round_up(B, 16))
    tb = max(SUBLANE, _round_up(tb, SUBLANE))
    b_pad = _round_up(B, tb)
    n_tiles = b_pad // tb

    # Flatten to [B, C*4]; zero-pad batch to a tile multiple.  Padded rows are
    # all-zero so they add nothing to the BN sums (kernel divides by real B).
    x_flat = x_nchw.reshape(B, K)
    if b_pad != B:
        x_flat = jnp.pad(x_flat, ((0, b_pad - B), (0, 0)))

    # ---- pass 1: conv (matmul) + batch statistics ------------------------
    k1_blocks = [tb * K * 4, K * c_pad * 2, 8 * c_pad * 4,
                 tb * c_pad * 4, 8 * c_pad * 4]
    y_conv, ab = pl.pallas_call(
        functools.partial(_conv_stats_kernel, inv_batch=1.0 / float(B)),
        grid=(n_tiles,),
        in_specs=[
            pl.BlockSpec((tb, K), lambda t: (t, 0)),          # x tile (f32)
            pl.BlockSpec((K, c_pad), lambda t: (0, 0)),       # conv taps (resident)
            pl.BlockSpec((8, c_pad), lambda t: (0, 0)),       # gamma/beta (resident)
        ],
        out_specs=(
            pl.BlockSpec((tb, c_pad), lambda t: (t, 0)),      # y tile
            pl.BlockSpec((8, c_pad), lambda t: (0, 0)),       # stats accumulator
        ),
        out_shape=(
            jax.ShapeDtypeStruct((b_pad, c_pad), jnp.float32),
            jax.ShapeDtypeStruct((8, c_pad), jnp.float32),
        ),
        compiler_params=pltpu.CompilerParams(
            # stats accumulate across the batch grid -> reduction axis
            # TODO(synk): per-core partial stats + combine would let this pass
            # use both v7x TensorCores; single-core is fine at these sizes.
            dimension_semantics=("arbitrary",),
            vmem_limit_bytes=_vmem_limit_bytes(k1_blocks)),
        cost_estimate=pl.CostEstimate(
            flops=2 * b_pad * K * c_pad,
            transcendentals=0,
            bytes_accessed=(b_pad * K * 4 + K * c_pad * 2 + 8 * c_pad * 4
                            + b_pad * c_pad * 4 + 8 * c_pad * 4)),
    )(x_flat, prep["wc"], prep["gb"])

    # ---- pass 2: normalize + MLP ------------------------------------------
    k2_blocks = [tb * c_pad * 4, 8 * c_pad * 4, c_pad * h_pad * 2,
                 h_pad * n_pad * 2, 8 * max_w * 4, tb * n_pad * 4]
    out_pad = pl.pallas_call(
        _bn_mlp_kernel,
        grid=(n_tiles,),
        in_specs=[
            pl.BlockSpec((tb, c_pad), lambda t: (t, 0)),      # y tile
            pl.BlockSpec((8, c_pad), lambda t: (0, 0)),       # BN affine (a, b)
            pl.BlockSpec((c_pad, h_pad), lambda t: (0, 0)),   # w1^T (resident)
            pl.BlockSpec((h_pad, n_pad), lambda t: (0, 0)),   # w2^T (resident)
            pl.BlockSpec((8, max_w), lambda t: (0, 0)),       # b1/b2 (resident)
        ],
        out_specs=pl.BlockSpec((tb, n_pad), lambda t: (t, 0)),
        out_shape=jax.ShapeDtypeStruct((b_pad, n_pad), jnp.float32),
        compiler_params=pltpu.CompilerParams(
            dimension_semantics=("parallel",),                # megacore on v7x
            vmem_limit_bytes=_vmem_limit_bytes(k2_blocks)),
        cost_estimate=pl.CostEstimate(
            flops=2 * b_pad * (c_pad * h_pad + h_pad * n_pad),
            transcendentals=0,
            bytes_accessed=(b_pad * c_pad * 4 + c_pad * h_pad * 2
                            + h_pad * n_pad * 2 + 8 * max_w * 4
                            + b_pad * n_pad * 4)),
    )(y_conv, ab, prep["w1t"], prep["w2t"], prep["bias"])

    if unpad:
        return out_pad[:B, :prep["n_out"]]
    # Lane/sublane-padded buffer; logical result is out_pad[:B, :n_out].
    return out_pad


# --------------------------------------------------------------------------
# Pure-JAX f32 reference mirroring the PyTorch forward (training-mode BN)
# --------------------------------------------------------------------------
def discriminator_reference(x_nchw, params):
    y = jax.lax.conv_general_dilated(
        x_nchw, params["conv_w"], window_strides=(2, 2),
        padding=((1, 1), (1, 1)),
        dimension_numbers=("NCHW", "OIHW", "NCHW"))
    y = y + params["conv_b"][None, :, None, None]
    mean = y.mean(axis=(0, 2, 3), keepdims=True)
    var = ((y - mean) ** 2).mean(axis=(0, 2, 3), keepdims=True)
    y = (y - mean) / jnp.sqrt(var + BN_EPS)
    y = y * params["bn_gamma"][None, :, None, None] + params["bn_beta"][None, :, None, None]
    y = jnp.where(y >= 0, y, LEAKY_SLOPE * y)
    y = y.reshape(y.shape[0], -1)
    h = y @ params["w1"].T + params["b1"]
    h = jnp.where(h >= 0, h, LEAKY_SLOPE * h)
    return h @ params["w2"].T + params["b2"]


if __name__ == "__main__":
    # Small, shape-consistent stand-in for the 512/512/40 defaults.  B is
    # deliberately NOT a multiple of the batch tile to exercise padding and
    # multi-tile BN statistics accumulation.
    latent_channels, hidden, n_attr = 64, 64, 16
    B = 24

    key = jax.random.PRNGKey(0)
    k_x, k_p = jax.random.split(key)
    params = init_params(k_p, latent_channels, hidden, n_attr)
    prep = prepare_params(params)
    x = jax.random.normal(k_x, (B, latent_channels, 2, 2), jnp.float32)

    out = jax.block_until_ready(discriminator_forward(x, prep, tb=16))
    ref = jax.block_until_ready(discriminator_reference(x, params))

    assert out.shape == (B, 2 * n_attr), out.shape
    # bf16 matmul operands in the kernel vs full-f32 reference -> relaxed tol.
    max_err = jnp.max(jnp.abs(out - ref))
    assert jnp.allclose(out, ref, atol=5e-2, rtol=5e-2), f"max abs err {max_err}"

    print("KERNEL_OK")
</pallas_src>

<mosaic_0001>
module attributes {stable_mosaic.version = 11 : i64} {
  func.func @_conv_stats_kernel(%arg0: i32, %arg1: memref<16x256xf32, #tpu.memory_space<vmem>>, %arg2: memref<256x128xbf16, #tpu.memory_space<vmem>>, %arg3: memref<8x128xf32, #tpu.memory_space<vmem>>, %arg4: memref<16x128xf32, #tpu.memory_space<vmem>>, %arg5: memref<8x128xf32, #tpu.memory_space<vmem>>) attributes {dimension_semantics = [#tpu.dimension_semantics<arbitrary>], iteration_bounds = array<i64: 2>, scalar_prefetch = 0 : i64, scratch_operands = 0 : i64, tpu.core_type = #tpu.core_type<tc>, window_params = [{transform_indices = @transform_0, window_bounds = array<i64: 16, 256>}, {pipeline_mode = #tpu.pipeline_mode<synchronous>, transform_indices = @transform_1, window_bounds = array<i64: 256, 128>}, {pipeline_mode = #tpu.pipeline_mode<synchronous>, transform_indices = @transform_2, window_bounds = array<i64: 8, 128>}, {transform_indices = @transform_3, window_bounds = array<i64: 16, 128>}, {pipeline_mode = #tpu.pipeline_mode<synchronous>, transform_indices = @transform_4, window_bounds = array<i64: 8, 128>}]} {
    %c0 = arith.constant 0 : index
    %c0_0 = arith.constant 0 : index
    %0 = vector.load %arg1[%c0, %c0_0] : memref<16x256xf32, #tpu.memory_space<vmem>>, vector<16x256xf32>
    %1 = arith.truncf %0 : vector<16x256xf32> to vector<16x256xbf16>
    %c0_1 = arith.constant 0 : index
    %c0_2 = arith.constant 0 : index
    %2 = vector.load %arg2[%c0_1, %c0_2] : memref<256x128xbf16, #tpu.memory_space<vmem>>, vector<256x128xbf16>
    %cst = arith.constant dense<0.000000e+00> : vector<16x128xf32>
    %3 = tpu.matmul %1, %2, %cst {dimension_numbers = #tpu.dot_dimension_numbers<[1], [0], [0], [1], [0, 0, 1, 1], [], []>} : vector<16x256xbf16>, vector<256x128xbf16>, vector<16x128xf32> -> vector<16x128xf32>
    %c0_3 = arith.constant 0 : index
    %c0_4 = arith.constant 0 : index
    %4 = vector.load %arg4[%c0_3, %c0_4] : memref<16x128xf32, #tpu.memory_space<vmem>>, vector<16x128xf32>
    tpu.vector_store %arg4[%c0_3, %c0_4], %3 {strides = array<i32>} : memref<16x128xf32, #tpu.memory_space<vmem>>, vector<16x128xf32>,
    %c0_i32 = arith.constant 0 : i32
    %5 = arith.cmpi eq, %arg0, %c0_i32 : i32
    %6 = arith.extui %5 : i1 to i32
    %c0_i32_5 = arith.constant 0 : i32
    %7 = arith.cmpi ne, %6, %c0_i32_5 : i32
    scf.if %7 {
      %cst_16 = arith.constant 0.000000e+00 : f32
      %22 = vector.broadcast %cst_16 : f32 to vector<8x128xf32>
      %c0_17 = arith.constant 0 : index
      %c0_18 = arith.constant 0 : index
      %23 = vector.load %arg5[%c0_17, %c0_18] : memref<8x128xf32, #tpu.memory_space<vmem>>, vector<8x128xf32>
      tpu.vector_store %arg5[%c0_17, %c0_18], %22 {strides = array<i32>} : memref<8x128xf32, #tpu.memory_space<vmem>>, vector<8x128xf32>,
    } else {
    }
    %c0_6 = arith.constant 0 : index
    %c0_7 = arith.constant 0 : index
    %8 = vector.load %arg5[%c0_6, %c0_7] : memref<8x128xf32, #tpu.memory_space<vmem>>, vector<1x128xf32>
    %cst_8 = arith.constant dense<0.000000e+00> : vector<128xf32>
    %9 = vector.multi_reduction <add>, %3, %cst_8 [0] : vector<16x128xf32> to vector<128xf32>
    %10 = vector.shape_cast %9 : vector<128xf32> to vector<1x128xf32>
    %11 = arith.addf %8, %10 : vector<1x128xf32>
    %c0_9 = arith.constant 0 : index
    %c0_10 = arith.constant 0 : index
    %12 = vector.load %arg5[%c0_9, %c0_10] : memref<8x128xf32, #tpu.memory_space<vmem>>, vector<1x128xf32>
    tpu.vector_store %arg5[%c0_9, %c0_10], %11 {strides = array<i32>} : memref<8x128xf32, #tpu.memory_space<vmem>>, vector<1x128xf32>,
    %c1 = arith.constant 1 : index
    %c0_11 = arith.constant 0 : index
    %13 = vector.load %arg5[%c1, %c0_11] : memref<8x128xf32, #tpu.memory_space<vmem>>, vector<1x128xf32>
    %14 = arith.mulf %3, %3 : vector<16x128xf32>
    %cst_12 = arith.constant dense<0.000000e+00> : vector<128xf32>
    %15 = vector.multi_reduction <add>, %14, %cst_12 [0] : vector<16x128xf32> to vector<128xf32>
    %16 = vector.shape_cast %15 : vector<128xf32> to vector<1x128xf32>
    %17 = arith.addf %13, %16 : vector<1x128xf32>
    %c1_13 = arith.constant 1 : index
    %c0_14 = arith.constant 0 : index
    %18 = vector.load %arg5[%c1_13, %c0_14] : memref<8x128xf32, #tpu.memory_space<vmem>>, vector<1x128xf32>
    tpu.vector_store %arg5[%c1_13, %c0_14], %17 {strides = array<i32>} : memref<8x128xf32, #tpu.memory_space<vmem>>, vector<1x128xf32>,
    %c1_i32 = arith.constant 1 : i32
    %19 = arith.cmpi eq, %arg0, %c1_i32 : i32
    %20 = arith.extui %19 : i1 to i32
    %c0_i32_15 = arith.constant 0 : i32
    %21 = arith.cmpi ne, %20, %c0_i32_15 : i32
    scf.if %21 {
      %c0_16 = arith.constant 0 : index
      %c0_17 = arith.constant 0 : index
      %22 = vector.load %arg5[%c0_16, %c0_17] : memref<8x128xf32, #tpu.memory_space<vmem>>, vector<1x128xf32>
      %cst_18 = arith.constant 0.0416666679 : f32
      %23 = vector.broadcast %cst_18 : f32 to vector<1x128xf32>
      %24 = arith.mulf %22, %23 : vector<1x128xf32>
      %c1_19 = arith.constant 1 : index
      %c0_20 = arith.constant 0 : index
      %25 = vector.load %arg5[%c1_19, %c0_20] : memref<8x128xf32, #tpu.memory_space<vmem>>, vector<1x128xf32>
      %cst_21 = arith.constant 0.0416666679 : f32
      %26 = vector.broadcast %cst_21 : f32 to vector<1x128xf32>
      %27 = arith.mulf %25, %26 : vector<1x128xf32>
      %28 = arith.mulf %24, %24 : vector<1x128xf32>
      %29 = arith.subf %27, %28 : vector<1x128xf32>
      %cst_22 = arith.constant 0.000000e+00 : f32
      %30 = vector.broadcast %cst_22 : f32 to vector<1x128xf32>
      %31 = arith.maximumf %29, %30 : vector<1x128xf32>
      %c0_23 = arith.constant 0 : index
      %c0_24 = arith.constant 0 : index
      %32 = vector.load %arg3[%c0_23, %c0_24] : memref<8x128xf32, #tpu.memory_space<vmem>>, vector<1x128xf32>
      %cst_25 = arith.constant 9.99999974E-6 : f32
      %33 = vector.broadcast %cst_25 : f32 to vector<1x128xf32>
      %34 = arith.addf %31, %33 : vector<1x128xf32>
      %35 = math.rsqrt %34 : vector<1x128xf32>
      %36 = arith.mulf %32, %35 : vector<1x128xf32>
      %c1_26 = arith.constant 1 : index
      %c0_27 = arith.constant 0 : index
      %37 = vector.load %arg3[%c1_26, %c0_27] : memref<8x128xf32, #tpu.memory_space<vmem>>, vector<1x128xf32>
      %38 = arith.mulf %24, %36 : vector<1x128xf32>
      %39 = arith.subf %37, %38 : vector<1x128xf32>
      %c1_28 = arith.constant 1 : index
      %c0_29 = arith.constant 0 : index
      %40 = vector.load %arg5[%c1_28, %c0_29] : memref<8x128xf32, #tpu.memory_space<vmem>>, vector<1x128xf32>
      tpu.vector_store %arg5[%c1_28, %c0_29], %39 {strides = array<i32>} : memref<8x128xf32, #tpu.memory_space<vmem>>, vector<1x128xf32>,
      %c0_30 = arith.constant 0 : index
      %c0_31 = arith.constant 0 : index
      %41 = vector.load %arg5[%c0_30, %c0_31] : memref<8x128xf32, #tpu.memory_space<vmem>>, vector<1x128xf32>
      tpu.vector_store %arg5[%c0_30, %c0_31], %36 {strides = array<i32>} : memref<8x128xf32, #tpu.memory_space<vmem>>, vector<1x128xf32>,
    } else {
    }
    return
  }
  func.func @transform_0(%arg0: i32) -> (i32, i32) {
    %c0_i32 = arith.constant 0 : i32
    %c0_i32_0 = arith.constant 0 : i32
    return %arg0, %c0_i32 : i32, i32
  }
  func.func @transform_1(%arg0: i32) -> (i32, i32) {
    %c0_i32 = arith.constant 0 : i32
    %c0_i32_0 = arith.constant 0 : i32
    %c0_i32_1 = arith.constant 0 : i32
    return %c0_i32, %c0_i32_0 : i32, i32
  }
  func.func @transform_2(%arg0: i32) -> (i32, i32) {
    %c0_i32 = arith.constant 0 : i32
    %c0_i32_0 = arith.constant 0 : i32
    %c0_i32_1 = arith.constant 0 : i32
    return %c0_i32, %c0_i32_0 : i32, i32
  }
  func.func @transform_3(%arg0: i32) -> (i32, i32) {
    %c0_i32 = arith.constant 0 : i32
    %c0_i32_0 = arith.constant 0 : i32
    return %arg0, %c0_i32 : i32, i32
  }
  func.func @transform_4(%arg0: i32) -> (i32, i32) {
    %c0_i32 = arith.constant 0 : i32
    %c0_i32_0 = arith.constant 0 : i32
    %c0_i32_1 = arith.constant 0 : i32
    return %c0_i32, %c0_i32_0 : i32, i32
  }
}

</mosaic_0001>

<bundles_post_ra>
// kernel: tpu_custom_call.1
= control target key start
LH: loop header
LB: loop body
LE: loop exit
PB: predicated region body
PF: predicated region fallthrough
CT: control target
= control target key end

     0   :  { %10 = vsyncpa [#allocation3], 0  ;;  %s1258_s0 = inlined_call_operand.hbm [shape: f32[32,256], index: 0, kind: input, shape index: {}]   ;;  %s1259_s1 = inlined_call_operand.hbm [shape: bf16[256,128], index: 1, kind: input, shape index: {}]   ;;  %s1260_s2 = inlined_call_operand.hbm [shape: f32[8,128], index: 2, kind: input, shape index: {}]   ;;  %s1261_s3 = inlined_call_operand.hbm [shape: f32[32,128], index: 3, kind: output, shape index: {0}]   ;;  %s1262_s4 = inlined_call_operand.hbm [shape: f32[8,128], index: 4, kind: output, shape index: {1}]  }
   0x1   :  { %12 = vsyncpa [#allocation3 + $0x1], 0 }
   0x2   :  { %13 = vsyncpa [#allocation6], 0 }
   0x3   :  { %14 = vsyncpa [#allocation4], 0 }
   0x4   :  { %16 = vsyncpa [#allocation4 + $0x1], 0 }
   0x5   :  { %17 = vsyncpa [#allocation10], 0  ;;  %s986_s15 = smov 0   ;;  %s988_s16 = smov 0  }
   0x6   :  { %s990_s17 = smov 0   ;;  %s992_s18 = smov 0  }
   0x7 LB: > { %s1007_s19 = sadd.s32 4294967295, %s947_s18   ;;  %s598_s20 = sadd.s32 4294967294, %s947_s18   ;;  %s947_s18 = sphi %s992_s18, %s1287_s18   ;;  %s943_s17 = sphi %s990_s17, %s1286_s17   ;;  %s939_s16 = sphi %s988_s16, %s1285_s16   ;;  %s935_s15 = sphi %s986_s15, %s1284_s15  }
   0x8   : > { %p43_p0 = scmp.ne.s32.totalorder %s939_s16, %s935_s15  ;;  %p1263_p1 = scmp.eq.s32.totalorder %s1007_s19, 0 }
   0x9   : > { %p115_p3 = scmp.eq.s32.totalorder %s598_s20, 1  ;;  %p599_p5 = scmp.ge.s32.totalorder %s947_s18, 1 }
   0xa   : > { %p1016_p4 = por %p1263_p1, %p43_p0  ;;  %p143_p7 = scmp.lt.s32.totalorder %s947_s18, 3 }
   0xb   : > { %p1021_p6 = por %p115_p3, %p43_p0  ;;  %s949_s24 = smov [#allocation5]  }
   0xc   : > { %s1266_s21 = scalar_select %p1016_p4, 1, 0 }
   0xd   : > { %s1267_s22 = scalar_select %p1021_p6, 1, 0 }
   0xe   : > { %p1027_p9 = pnand %p599_p5, %p143_p7  ;;  %s155_s25 = sshll.u32 %s949_s24, 4  ;;  %s1031_s25 = int_to_ptr.vmem [resolvable:$true] %s155_s25 }
   0xf   : > { %s950_s27 = smov [#allocation7]   ;;  %s761_s5 = scalar_lea.hbm %s1259_s1, 2048 }
  0x10   : > { %p678_p10 = pneg %p1027_p9  ;;  %s169_s28 = sshll.u32 %s950_s27, 4  ;;  %s1042_s28 = int_to_ptr.vmem [resolvable:$true] %s169_s28 }
  0x11   : > { %p762_p13 = scmp.ne.s32.totalorder %s1259_s1, %s761_s5  ;;  %p768_p7 = scmp.lt.u32.totalorder %s761_s5, %s1259_s1 }
  0x12   : > { %p1038_p12 = pnand %p678_p10, %p1263_p1 }
  0x14   : > { %p763_p0 = pneg %p1038_p12 }
  0x16   : > { %p764_p3 = pnand %p763_p0, %p762_p13 }
  0x18   : > { %p765_p5 = pneg %p764_p3 }
  0x1a   : > { %p770_p10 = pnand %p768_p7, %p765_p5 }
  0x1c   : > { %773 = shalt.err (!%p770_p10)
}
  0x1d   : > { %s774_s10 = scalar_lea.vmem %s1031_s25, 2048  ;;  %p782_p2 = scmp.lt.s32.totalorder %s1031_s25, %s1031_s25 }
  0x1e   : > { %p775_p11 = scmp.ne.s32.totalorder %s1031_s25, %s774_s10  ;;  %p783_p13 = scmp.lt.s32.totalorder %s774_s10, %s774_s10 }
  0x20   : > { %p777_p8 = pnand %p775_p11, %p763_p0  ;;  %p784_p3 = por %p783_p13, %p782_p2 }
  0x22   : > { %p778_p1 = pneg %p777_p8 }
  0x24   : > { %p785_p6 = pnand %p784_p3, %p778_p1 }
  0x26   : > { %788 = shalt.err (!%p785_p6)
}
  0x27   : > { %s951_s11 = smov 64   ;;  %s952_s12 = smov 4  }
  0x28   : > { %681 = dma.hbm_to_vmem [thread:$0]  (!%p1038_p12), %s1259_s1, 2048, %s1031_s25, [#allocation6], %s951_s11, %s951_s11, %s952_s12  }
  0x29   : > { %s789_s27 = scalar_lea.hbm %s1260_s2, 128 }
  0x2a   : > { %p790_p2 = scmp.ne.s32.totalorder %s1260_s2, %s789_s27  ;;  %p796_p8 = scmp.lt.u32.totalorder %s789_s27, %s1260_s2 }
  0x2c   : > { %p792_p1 = pnand %p790_p2, %p763_p0 }
  0x2e   : > { %p793_p6 = pneg %p792_p1 }
  0x30   : > { %p798_p11 = pnand %p796_p8, %p793_p6 }
  0x32   : > { %801 = shalt.err (!%p798_p11)
}
  0x33   : > { %s802_s25 = scalar_lea.vmem %s1042_s28, 128  ;;  %p810_p13 = scmp.lt.s32.totalorder %s1042_s28, %s1042_s28 }
  0x34   : > { %p803_p5 = scmp.ne.s32.totalorder %s1042_s28, %s802_s25  ;;  %p811_p3 = scmp.lt.s32.totalorder %s802_s25, %s802_s25 }
  0x36   : > { %p805_p7 = pnand %p803_p5, %p763_p0  ;;  %p812_p2 = por %p811_p3, %p810_p13 }
  0x38   : > { %p806_p10 = pneg %p805_p7 }
  0x3a   : > { %p813_p1 = pnand %p812_p2, %p806_p10 }
  0x3c   : > { %816 = shalt.err (!%p813_p1)
}
  0x3d   : > { %684 = dma.hbm_to_vmem [thread:$0]  (!%p1038_p12), %s1260_s2, 128, %s1042_s28, [#allocation6]  }
  0x3e   : > { %s1097_s9 = sadd.s32 1, %s947_s18   ;;  %s30_s26 = sadd.s32 1, %s943_s17 }
  0x3f   : > { %s27_s10 = ssub.s32 %s947_s18, %s1097_s9  ;;  %p37_p0 = scmp.ne.s32.totalorder %s943_s17, %s939_s16 }
  0x40   : > { %p28_p6 = scmp.eq.s32.totalorder %s27_s10, 0  ;;  %p38_p8 = scmp.eq.s32.totalorder %s947_s18, 0 }
  0x41   : > { %p1270_p11 = scmp.eq.s32.totalorder %s1007_s19, 1  ;;  %p695_p7 = scmp.lt.s32.totalorder %s947_s18, 2 }
  0x42   : > { %s1113_s12 = scalar_select %p28_p6, %s943_s17, %s30_s26  }
  0x43   : > { %p1107_p5 = por %p1270_p11, %p37_p0  ;;  %p39_p10 = por %p38_p8, %p37_p0 }
  0x44   : > { %s180_s13 = sand.u32 1, %s943_s17   ;;  %s638_s28 = sshll.u32 %s947_s18, 9 }
  0x45   : > { %s1271_s11 = scalar_select %p1107_p5, 1, 0 }
  0x46   : > { %s603_s14 = sshll.u32 %s180_s13, 5  ;;  %s1120_s27 = scalar_lea.hbm %s1258_s0, %s638_s28 }
  0x47   : > { %s184_s29 = scalar_lea.vmem [#allocation2], %s603_s14  ;;  %p1124_p12 = pnand %p695_p7, %p39_p10 }
  0x48   : > { %s192_s30 = sshll.u32 %s184_s29, 4  ;;  %s1128_s6 = scalar_lea.sflag [#allocation3], %s180_s13  ;;  %s1122_s30 = int_to_ptr.vmem [resolvable:$true] %s192_s30 }
  0x49   : > { %s817_s25 = scalar_lea.hbm %s1120_s27, 512  ;;  %p819_p3 = pneg %p1124_p12 }
  0x4a   : > { %p818_p13 = scmp.ne.s32.totalorder %s1120_s27, %s817_s25  ;;  %s822_s26 = scalar_lea.hbm %s1258_s0, 1024 }
  0x4b   : > { %p823_p0 = scmp.lt.u32.totalorder %s1120_s27, %s1258_s0  ;;  %p824_p6 = scmp.lt.u32.totalorder %s822_s26, %s817_s25 }
  0x4c   : > { %p820_p2 = pnand %p819_p3, %p818_p13  ;;  %p826_p11 = scmp.lt.u32.totalorder %s817_s25, %s1120_s27 }
  0x4d   : > { %p825_p8 = por %p824_p6, %p823_p0 }
  0x4e   : > { %p821_p1 = pneg %p820_p2 }
  0x4f   : > { %p827_p7 = por %p826_p11, %p825_p8 }
  0x51   : > { %p828_p10 = pnand %p827_p7, %p821_p1 }
  0x53   : > { %831 = shalt.err (!%p828_p10)
}
  0x54   : > { %s832_s13 = scalar_lea.vmem %s1122_s30, 512  ;;  %s953_s28 = smov [#allocation2]  }
  0x55   : > { %p833_p13 = scmp.ne.s32.totalorder %s1122_s30, %s832_s13  ;;  %s837_s20 = sshll.u32 %s953_s28, 4  ;;  %s838_s20 = int_to_ptr.vmem [resolvable:$false] %s837_s20 }
  0x56   : > { %s839_s24 = scalar_lea.vmem %s838_s20, 1024  ;;  %p840_p4 = scmp.lt.s32.totalorder %s1122_s30, %s838_s20 }
  0x57   : > { %p835_p2 = pnand %p833_p13, %p819_p3  ;;  %p841_p0 = scmp.lt.s32.totalorder %s839_s24, %s832_s13 }
  0x59   : > { %p836_p5 = pneg %p835_p2  ;;  %p842_p6 = por %p841_p0, %p840_p4 }
  0x5b   : > { %p843_p8 = pnand %p842_p6, %p836_p5 }
  0x5d   : > { %846 = shalt.err (!%p843_p8)
}
  0x5e   : > { %s954_s29 = smov 256   ;;  %s955_s25 = smov 16  }
  0x5f   : > { %688 = dma.hbm_to_vmem [thread:$0]  (!%p1124_p12), %s1120_s27, 512, %s1122_s30, %s1128_s6, %s954_s29, %s954_s29, %s955_s25  }
  0x60   : > { %204 = sbr.rel (%p1027_p9) target bundleno = 464 (0x1d0), region = 32  ;;  %s1159_s7 = sand.u32 (!%p1027_p9), 1, %s939_s16  }
  0x61   : > { %s608_s8 = sshll.u32 (!%p1027_p9), %s1159_s7, 5  ;;  %s207_s26 = scalar_lea.sflag (!%p1027_p9), [#allocation3], %s1159_s7 }
  0x62   : > { %s1163_s10 = scalar_lea.vmem (!%p1027_p9), [#allocation2], %s608_s8  ;;  %p1273_p4 = scmp.ne.s32.totalorder (!%p1027_p9), %s1266_s21, 0 }
  0x67   : > { %918 = dma.done.wait (%p1273_p4), %s207_s26, 512  }
  0x68   : > { %920 = vsyncadd (%p1273_p4), %s207_s26, 4294966784  ;;  %p1274_p5 = scmp.eq.s32.totalorder %s1007_s19, 0 }
  0x6a   : > { %922 = dma.done.wait (%p1274_p5), [#allocation6], 2176   ;;  %p1275_p9 = pmov %p1274_p5 }
  0x6b   : > { %v743_v0 = vld [vmem:[#allocation5 + $0x40] sm:$0xff]   ;;  %v745_v2 = vld [vmem:[#allocation5 + $0x48] sm:$0xff]   ;;  %v747_v4 = vld [vmem:[#allocation5 + $0x50] sm:$0xff]   ;;  %s611_s21 = sshll.u32 %s1159_s7, 4  ;;  %p1276_p12 = scmp.ne.s32.totalorder %s1007_s19, 0 }
  0x6c   : > { %924 = vsyncadd (%p1275_p9), [#allocation6], 4294965120  ;;  %v744_v1 = vld [vmem:[#allocation5] sm:$0xff]   ;;  %640 = vmatprep.subr.bf16.mxu0 %v743_v0  ;;  %v746_v3 = vld [vmem:[#allocation5 + $0x8] sm:$0xff]   ;;  %s1178_s23 = scalar_lea.vmem [#allocation8], %s611_s21  ;;  %v956_v28 = vmov (!%p1276_p12), 0.0  }
  0x6d   : > { %641 = vmatpush3.bf16.msra.mxu0 %v744_v1  ;;  %v748_v5 = vld [vmem:[#allocation5 + $0x10] sm:$0xff]   ;;  %v749_v6 = vld [vmem:[#allocation5 + $0x58] sm:$0xff]   ;;  %v751_v8 = vld [vmem:[#allocation5 + $0x60] sm:$0xff]   ;;  %427 = vst [vmem:[#allocation9] sm:$0xff] (!%p1276_p12), %v956_v28 }
  0x6e   : > { %642 = vmatprep.subr.bf16.mxu0 %v745_v2  ;;  %v750_v7 = vld [vmem:[#allocation5 + $0x18] sm:$0xff]   ;;  %v752_v9 = vld [vmem:[#allocation5 + $0x20] sm:$0xff]   ;;  %v753_v10 = vld [vmem:[#allocation5 + $0x68] sm:$0xff]  }
  0x6f   : > { %v247_v11 = vld [vmem:[%s1163_s10 + $0x8] sm:$0xff]  ;;  %v249_v12 = vld [vmem:[%s1163_s10 + $0x18] sm:$0xff]  ;;  %v755_v15 = vld [vmem:[#allocation5 + $0x70] sm:$0xff]  }
  0x70   : > { %v251_v13 = vpack.c.bf16 %v249_v12, %v247_v11  ;;  %v754_v14 = vld [vmem:[#allocation5 + $0x28] sm:$0xff]   ;;  %v756_v16 = vld [vmem:[#allocation5 + $0x30] sm:$0xff]   ;;  %v757_v17 = vld [vmem:[#allocation5 + $0x78] sm:$0xff]  }
  0x71   : > { %643 = vmatpush3.bf16.msra.mxu0 %v746_v3  ;;  %v758_v18 = vld [vmem:[#allocation5 + $0x38] sm:$0xff]   ;;  %v246_v19 = vld [vmem:[%s1163_s10] sm:$0xff]  ;;  %v248_v20 = vld [vmem:[%s1163_s10 + $0x10] sm:$0xff] }
  0x72   : > { %644 = vmatprep.subr.bf16.mxu0 %v747_v4  ;;  %412 = vmatprep.mubr.bf16.mxu0 %v251_v13  ;;  %v250_v21 = vpack.c.bf16 %v248_v20, %v246_v19 }
  0x75   : > { %645 = vmatpush3.bf16.msra.mxu0 %v748_v5 }
  0x76   : > { %646 = vmatprep.subr.bf16.mxu0 %v749_v6 }
  0x79   : > { %647 = vmatpush3.bf16.msra.mxu0 %v750_v7 }
  0x7a   : > { %648 = vmatprep.subr.bf16.mxu0 %v751_v8 }
  0x7d   : > { %649 = vmatpush3.bf16.msra.mxu0 %v752_v9 }
  0x7e   : > { %650 = vmatprep.subr.bf16.mxu0 %v753_v10 }
  0x81   : > { %651 = vmatpush3.bf16.msra.mxu0 %v754_v14 }
  0x82   : > { %652 = vmatprep.subr.bf16.mxu0 %v755_v15 }
  0x85   : > { %653 = vmatpush3.bf16.msra.mxu0 %v756_v16 }
  0x86   : > { %654 = vmatprep.subr.bf16.mxu0 %v757_v17 }
  0x89   : > { %655 = vmatpush3.bf16.msra.mxu0 %v758_v18 }
  0x8c   : > { %413 = vmatmul.mubr.bf16.vlgmr.msra.gmra.mrb[0].mxu0 %v250_v21 }
 0x15f   : > { %v656_v22 = vpop.f32.mrb[0].mxu0  ;;  %426 = sbr.rel (%p1276_p12) target bundleno = 358 (0x166), region = 48 }
 0x160   : > { %v657_v23 = vpop.f32.mrb[1].mxu0 }
 0x161   : > { %v658_v24 = vadd.f32 %v657_v23, %v656_v22  ;;  %v659_v25 = vpop.f32.mrb[2].mxu0 }
 0x162   : > { %v660_v26 = vpop.f32.mrb[3].mxu0 }
 0x163   : > { %421 = vst [vmem:[%s1178_s23] sm:$0xff] %v658_v24  ;;  %v661_v27 = vadd.f32 %v660_v26, %v659_v25 }
 0x165   : > { %422 = vst [vmem:[%s1178_s23 + $0x8] sm:$0xff] %v661_v27 }
 0x166 PF: > { %v429_v29 = vadd.f32 %v661_v27, %v658_v24  ;;  %v439_v30 = vmul.f32 %v658_v24, %v658_v24  ;;  %v440_v31 = vmul.f32 %v661_v27, %v661_v27  ;;  %v428_v42 = vld [vmem:[#allocation9] sm:$0x1]  ;;  %v438_v45 = vld [vmem:[#allocation9 + $0x1] sm:$0x1]  ;;  %p629_p3 = scmp.ne.s32.totalorder %s1007_s19, 1 }
 0x167   : > { %v461_v57 = vld [vmem:[#allocation7] sm:$0x1] (!%p629_p3)  ;;  %v465_v60 = vld [vmem:[#allocation7 + $0x1] sm:$0x1] (!%p629_p3) }
 0x168   : > { %v430_v32 = vrot.slane %v429_v29, 4  ;;  %v441_v33 = vadd.f32 %v440_v31, %v439_v30 }
 0x16a   : > { %v431_v34 = vadd.f32 %v430_v32, %v429_v29  ;;  %v442_v35 = vrot.slane %v441_v33, 4 }
 0x16c   : > { %v432_v36 = vrot.slane %v431_v34, 2  ;;  %v443_v37 = vadd.f32 %v442_v35, %v441_v33 }
 0x16e   : > { %v433_v38 = vadd.f32 %v432_v36, %v431_v34  ;;  %v444_v39 = vrot.slane %v443_v37, 2 }
 0x170   : > { %v434_v40 = vrot.slane %v433_v38, 1  ;;  %v445_v41 = vadd.f32 %v444_v39, %v443_v37 }
 0x172   : > { %v435_v43 = vadd.f32 %v434_v40, %v433_v38  ;;  %v446_v44 = vrot.slane %v445_v41, 1  ;;  %453 = sbr.rel (%p629_p3) target bundleno = 410 (0x19a), region = 52 }
 0x174   : > { %v436_v46 = vadd.f32 %v435_v43, %v428_v42  ;;  %v447_v47 = vadd.f32 %v446_v44, %v445_v41 }
 0x176   : > { %437 = vst [vmem:[#allocation9] sm:$0x1] %v436_v46  ;;  %v448_v48 = vadd.f32 %v447_v47, %v438_v45 }
 0x178   : > { %449 = vst [vmem:[#allocation9 + $0x1] sm:$0x1] %v448_v48 }
 0x17d   : > { %v454_v49 = vld [vmem:[#allocation9] sm:$0x1] }
 0x17e   : > { %v455_v51 = vmul.f32 0.041666668, %v454_v49 }
 0x17f   : > { %v456_v50 = vld [vmem:[#allocation9 + $0x1] sm:$0x1] }
 0x180   : > { %v457_v52 = vmul.f32 0.041666668, %v456_v50  ;;  %v458_v53 = vmul.f32 %v455_v51, %v455_v51 }
 0x182   : > { %v459_v54 = vsub.f32 %v457_v52, %v458_v53 }
 0x184   : > { %v460_v55 = vmax.f32 %v459_v54, 0.0 }
 0x186   : > { %v462_v56 = vadd.f32 1e-05, %v460_v55 }
 0x188   : > { %759 = vrsqrt.f32 %v462_v56 }
 0x192   : > { %v760_v58 = vpop.eup %759 }
 0x193   : > { %v464_v59 = vmul.f32 %v760_v58, %v461_v57 }
 0x195   : > { %v466_v61 = vmul.f32 %v464_v59, %v455_v51  ;;  %469 = vst [vmem:[#allocation9] sm:$0x1] %v464_v59 }
 0x197   : > { %v467_v62 = vsub.f32 %v465_v60, %v466_v61 }
 0x199   : > { %468 = vst [vmem:[#allocation9 + $0x1] sm:$0x1] %v467_v62 }
 0x19a PF: > { %s639_s27 = sshll.u32 %s1007_s19, 8  ;;  %s484_s14 = sshll.u32 %s1178_s23, 4  ;;  %s1192_s14 = int_to_ptr.vmem [resolvable:$true] %s484_s14 }
 0x19b   : > { %s1189_s6 = scalar_lea.hbm %s1261_s3, %s639_s27  ;;  %s471_s13 = scalar_lea.sflag [#allocation4], %s1159_s7 }
 0x19c   : > { %s847_s28 = scalar_lea.vmem %s1192_s14, 256  ;;  %p1277_p11 = scmp.ne.s32.totalorder %s1271_s11, 0 }
 0x19d   : > { %p848_p1 = scmp.ne.s32.totalorder %s1192_s14, %s847_s28  ;;  %s957_s20 = smov [#allocation8]  }
 0x19e   : > { %s851_s24 = sshll.u32 %s957_s20, 4  ;;  %s852_s24 = int_to_ptr.vmem [resolvable:$false] %s851_s24 }
 0x19f   : > { %p849_p7 = pnand %p848_p1, %p1277_p11  ;;  %s853_s29 = scalar_lea.vmem %s852_s24, 512 }
 0x1a0   : > { %p854_p13 = scmp.lt.s32.totalorder %s1192_s14, %s852_s24  ;;  %p855_p2 = scmp.lt.s32.totalorder %s853_s29, %s847_s28 }
 0x1a1   : > { %p850_p10 = pneg %p849_p7 }
 0x1a2   : > { %p856_p0 = por %p855_p2, %p854_p13 }
 0x1a4   : > { %p857_p6 = pnand %p856_p0, %p850_p10 }
 0x1a6   : > { %860 = shalt.err (!%p857_p6)
}
 0x1a7   : > { %s861_s25 = scalar_lea.hbm %s1189_s6, 256  ;;  %s865_s10 = scalar_lea.hbm %s1261_s3, 512 }
 0x1a8   : > { %p862_p8 = scmp.ne.s32.totalorder %s1189_s6, %s861_s25  ;;  %p866_p9 = scmp.lt.u32.totalorder %s1189_s6, %s1261_s3 }
 0x1a9   : > { %p867_p12 = scmp.lt.u32.totalorder %s865_s10, %s861_s25  ;;  %p869_p1 = scmp.lt.u32.totalorder %s861_s25, %s1189_s6 }
 0x1aa   : > { %p863_p4 = pnand %p862_p8, %p1277_p11 }
 0x1ab   : > { %p868_p3 = por %p867_p12, %p866_p9 }
 0x1ac   : > { %p864_p5 = pneg %p863_p4 }
 0x1ad   : > { %p870_p7 = por %p869_p1, %p868_p3 }
 0x1af   : > { %p871_p10 = pnand %p870_p7, %p864_p5 }
 0x1b1   : > { %874 = shalt.err (!%p871_p10)
}
 0x1b2   : > { %s958_s27 = smov 128   ;;  %s959_s30 = smov 8  }
 0x1b3   : > { %672 = dma.vmem_to_hbm [thread:$0]  (%p1277_p11), %s1192_s14, 256, %s1189_s6, %s471_s13, %s958_s27, %s958_s27, %s959_s30  }
 0x1b4   : > { %s960_s5 = smov [#allocation9]   ;;  %p1278_p2 = scmp.eq.s32.totalorder %s1007_s19, 1 }
 0x1b5   : > { %s498_s28 = sshll.u32 %s960_s5, 4  ;;  %s499_s28 = int_to_ptr.vmem [resolvable:$true] %s498_s28 }
 0x1b6   : > { %s875_s20 = scalar_lea.vmem %s499_s28, 128  ;;  %p882_p8 = scmp.lt.s32.totalorder %s499_s28, %s499_s28 }
 0x1b7   : > { %p876_p13 = scmp.ne.s32.totalorder %s499_s28, %s875_s20  ;;  %p883_p4 = scmp.lt.s32.totalorder %s875_s20, %s875_s20 }
 0x1b9   : > { %p877_p0 = pnand %p876_p13, %p1278_p2  ;;  %p884_p5 = por %p883_p4, %p882_p8 }
 0x1bb   : > { %p878_p6 = pneg %p877_p0 }
 0x1bd   : > { %p885_p9 = pnand %p884_p5, %p878_p6 }
 0x1bf   : > { %888 = shalt.err (!%p885_p9)
}
 0x1c0   : > { %s889_s11 = scalar_lea.hbm %s1262_s4, 128  ;;  %p1279_p12 = pmov %p1278_p2 }
 0x1c1   : > { %p890_p11 = scmp.ne.s32.totalorder %s1262_s4, %s889_s11  ;;  %p895_p7 = scmp.lt.u32.totalorder %s889_s11, %s1262_s4 }
 0x1c3   : > { %p891_p3 = pnand %p890_p11, %p1279_p12 }
 0x1c5   : > { %p892_p1 = pneg %p891_p3 }
 0x1c7   : > { %p897_p10 = pnand %p895_p7, %p892_p1 }
 0x1c9   : > { %900 = shalt.err (!%p897_p10)
}
 0x1ca   : > { %p1280_p13 = pmov %p1278_p2 }
 0x1cc   : > { %674 = dma.vmem_to_hbm [thread:$0]  (%p1280_p13), %s499_s28, 128, %s1262_s4, [#allocation10]  }
 0x1cd   : > { %926 = dma.done.wait (%p1278_p2), [#allocation10], 128   ;;  %p1281_p0 = pmov %p1278_p2 }
 0x1cf   : > { %928 = vsyncadd (%p1281_p0), [#allocation10], 4294967168 }
 0x1d0 PF: > { %s514_s26 = sand.u32 1, %s935_s15   ;;  %p1282_p6 = scmp.ne.s32.totalorder %s1267_s22, 0 }
 0x1d1   : > { %p1283_p8 = scmp.ge.s32.totalorder %s947_s18, 2  ;;  %s515_s10 = scalar_lea.sflag [#allocation4], %s514_s26 }
 0x1d3   : > { %p690_p4 = pnand %p1283_p8, %p1282_p6 }
 0x1d5   : > { %930 = dma.done.wait (!%p690_p4), %s515_s10, 256  }
 0x1d6   : > { %932 = vsyncadd (!%p690_p4), %s515_s10, 4294967040  ;;  %p20_p5 = scmp.ge.s32.totalorder %s1097_s9, 4   ;;  %s1284_s15 = smov %s939_s16 }
 0x1d7   : > { %s1285_s16 = smov %s943_s17  ;;  %s1286_s17 = smov %s1113_s12 }
 0x1d8   : > { %s1287_s18 = smov %s1097_s9  ;;  %22 = sbr.rel (!%p20_p5) target bundleno = 7 (0x7), region = 101 }
 0x1df   :  { %520 = vsyncpa [#allocation3], 1 }
 0x1e0   :  { %522 = vsyncpa [#allocation3 + $0x1], 1 }
 0x1e1   :  { %523 = vsyncpa [#allocation6], 1 }
 0x1e2   :  { %524 = vsyncpa [#allocation4], 1 }
 0x1e3   :  { %526 = vsyncpa [#allocation4 + $0x1], 1 }
 0x1e4   :  { %527 = vsyncpa [#allocation10], 1 }

</bundles_post_ra>
